<compile_context>
chip_gen: v6e
topology: v6e:2x2x1
jax: 0.10.0
libtpu: 0.0.40
codegen_flags: <defaults>
</compile_context>

<pallas_src>
import functools

import jax
import jax.numpy as jnp
from jax import lax
from jax.experimental import pallas as pl
from jax.experimental.pallas import tpu as pltpu


def _round_up(x, m):
    return (x + m - 1) // m * m


def _cdiv(a, b):
    return (a + b - 1) // b


# ---------------------------------------------------------------------------
# Pallas kernel: K-tiled fused wide matmul + bias + activation + sigmoid gate
# ---------------------------------------------------------------------------
def _gated_matmul_kernel(p_ref, w_ref, b_ref, o_ref, acc_ref, *,
                         c_out, c_out_pad, activation):
    k = pl.program_id(1)

    @pl.when(k == 0)
    def _init():
        acc_ref[...] = jnp.zeros_like(acc_ref)

    # One wide MXU matmul covering both the h- and g-branch (f32 accumulate).
    acc_ref[...] += jnp.dot(p_ref[...], w_ref[...],
                            preferred_element_type=jnp.float32)

    @pl.when(k == pl.num_programs(1) - 1)
    def _epilogue():
        acc = acc_ref[...] + b_ref[...]          # fused bias (1, 2*c_out_pad)
        h = acc[:, :c_out_pad]                   # lane-aligned h/g split
        g = acc[:, c_out_pad:]
        if activation is not None:
            h = activation(h)
        # Numerically-safe sigmoid: exp(-|g|) never overflows; exp and the
        # approx reciprocal both run on the EUP (free next to the MXU).
        e = jnp.exp(-jnp.abs(g))
        gate = pl.reciprocal(1.0 + e, approx=True)
        gate = jnp.where(g >= 0, gate, 1.0 - gate)
        res = (h * gate).astype(o_ref.dtype)
        # Store only the real channels: dense unmasked store when C_out is a
        # multiple of 128, masked narrow store (but 16x fewer bytes) otherwise.
        o_ref[...] = res[:, :c_out]


def _fused_gated_matmul(patches, w_cat, b_cat, *, c_out, c_out_pad,
                        tile_m, tile_k, activation, vmem_limit):
    """patches: (M, K_pad) bf16; w_cat: (K_pad, 2*c_out_pad) bf16;
    b_cat: (1, 2*c_out_pad) f32.  Returns (M, c_out) f32."""
    M, K_pad = patches.shape
    _, two_c = w_cat.shape
    grid_m = _cdiv(M, tile_m)
    grid_k = K_pad // tile_k                      # exact by construction

    kernel = functools.partial(_gated_matmul_kernel, c_out=c_out,
                               c_out_pad=c_out_pad, activation=activation)
    return pl.pallas_call(
        kernel,
        out_shape=jax.ShapeDtypeStruct((M, c_out), jnp.float32),
        grid=(grid_m, grid_k),
        in_specs=[
            pl.BlockSpec((tile_m, tile_k), lambda i, k: (i, k)),   # patch rows
            pl.BlockSpec((tile_k, two_c), lambda i, k: (k, 0)),    # fused W
            pl.BlockSpec((1, two_c), lambda i, k: (0, 0)),         # fused bias
        ],
        out_specs=pl.BlockSpec((tile_m, c_out), lambda i, k: (i, 0)),
        scratch_shapes=[pltpu.VMEM((tile_m, two_c), jnp.float32)],
        compiler_params=pltpu.CompilerParams(
            dimension_semantics=("parallel", "arbitrary"),
            vmem_limit_bytes=vmem_limit),
    )(patches, w_cat, b_cat)


# ---------------------------------------------------------------------------
# Tiling heuristics (per-generation)
# ---------------------------------------------------------------------------
def _tpu_budgets():
    """Returns (tile_m cap, vmem_limit_bytes) gated per TPU generation."""
    try:
        vmem_phys = int(pltpu.get_tpu_info().vmem_capacity_bytes)
    except Exception:
        vmem_phys = 64 << 20                      # conservative (v7x per-TC)
    if vmem_phys >= (100 << 20):                  # v5e / v6e: 128 MiB physical
        return 1024, 64 << 20
    return 512, 32 << 20                          # v7x: 64 MiB per TC


def _pick_tile_m(M, cap):
    """M is a multiple of 8.  Aim for >=2 grid steps (and an even step count)
    so the 'parallel' M axis shards evenly across the 2 v7x TensorCores."""
    if M <= 256:
        return M
    tile = max(128, min(cap, _round_up(_cdiv(M, 2), 128)))
    tile = min(tile, M)
    grid = _cdiv(M, tile)
    if grid > 1 and grid % 2 == 1:
        for g2 in (grid + 1, grid + 3):
            cand = max(128, _round_up(_cdiv(M, g2), 128))
            if cand <= M and _cdiv(M, cand) % 2 == 0:
                return cand
    return tile


def _fits_vmem(tile_m, tile_k, two_c, c_out, limit):
    need = (2 * tile_m * tile_k * 2        # patch blocks (bf16, double-buffered)
            + 2 * tile_k * two_c * 2       # fused weight blocks (bf16)
            + 2 * two_c * 4                # fused bias
            + tile_m * two_c * 4           # f32 accumulator scratch
            + 2 * tile_m * c_out * 4)      # output blocks
    return need <= int(limit * 0.75)


# ---------------------------------------------------------------------------
# Gated ConvTranspose2d: stride-phase decomposition + fused Pallas matmul
# ---------------------------------------------------------------------------
@functools.partial(
    jax.jit,
    static_argnames=("stride", "padding", "output_padding", "dilation",
                     "activation"))
def gated_conv_transpose2d(x, params, *, stride, padding, output_padding=0,
                           dilation=1, activation=None):
    """x: (N, C_in, H, W) f32 NCHW; params = (w_h, b_h, w_g, b_g) with
    w_*: (C_in, C_out, KH, KW) laid out as nn.ConvTranspose2d.weight."""
    wh, bh, wg, bg = params
    C_in, C_out, KH, KW = wh.shape
    N, _, H, W = x.shape
    s, p, op, d = stride, padding, output_padding, dilation
    H_out = (H - 1) * s - 2 * p + d * (KH - 1) + op + 1
    W_out = (W - 1) * s - 2 * p + d * (KW - 1) + op + 1

    c_out_pad = _round_up(C_out, 128)
    two_c = 2 * c_out_pad
    tile_cap, vmem_limit = _tpu_budgets()

    # ---- static per-phase tap / offset tables (pure Python ints) -----------
    # Output pixel oh of phase rh = oh % s receives contributions only from
    # taps kh with kh*d == rh + p (mod s); its input row is t + base_h(kh)
    # where oh = rh + s*t.  Same for columns.  (No kernel flip needed.)
    def _taps(r, KK):
        taps = [kk for kk in range(KK) if (r + p - kk * d) % s == 0]
        base = {kk: (r + p - kk * d) // s for kk in taps}
        return taps, base

    phase_info = []
    pad_t = pad_b = pad_l = pad_r = 0
    for rh in range(s):
        Ho_r = len(range(rh, H_out, s))
        taps_h, base_h = _taps(rh, KH)
        for rw in range(s):
            Wo_r = len(range(rw, W_out, s))
            taps_w, base_w = _taps(rw, KW)
            phase_info.append((rh, rw, taps_h, base_h, Ho_r, taps_w, base_w, Wo_r))
            if taps_h and Ho_r:
                pad_t = max(pad_t, -min(base_h.values()))
                pad_b = max(pad_b, max(base_h.values()) + Ho_r - 1 - (H - 1))
            if taps_w and Wo_r:
                pad_l = max(pad_l, -min(base_w.values()))
                pad_r = max(pad_r, max(base_w.values()) + Wo_r - 1 - (W - 1))

    # One shared padded NHWC bf16 copy of the (un-dilated) input, reused by
    # every phase/tap slice.  bf16 halves the dominant HBM stream; the MXU
    # accumulates in f32 inside the kernel.
    x_nhwc = jnp.transpose(x, (0, 2, 3, 1)).astype(jnp.bfloat16)
    xp = jnp.pad(x_nhwc, ((0, 0), (pad_t, pad_b), (pad_l, pad_r), (0, 0)))

    # Fused bias [h | g] along the lane dim.
    def _pad_bias(b):
        return jnp.pad(b.astype(jnp.float32).reshape(1, C_out),
                       ((0, 0), (0, c_out_pad - C_out)))
    b_cat = jnp.concatenate([_pad_bias(bh), _pad_bias(bg)], axis=1)

    def _flat_w(w, taps_hh, taps_ww):
        w_sub = w[:, :, taps_hh][:, :, :, taps_ww]        # (C_in, C_out, Th, Tw)
        w_sub = jnp.transpose(w_sub, (2, 3, 0, 1))        # (Th, Tw, C_in, C_out)
        return w_sub.reshape(len(taps_hh) * len(taps_ww) * C_in, C_out)

    out_nhwc = jnp.zeros((N, H_out, W_out, C_out), jnp.float32)

    for (rh, rw, taps_h, base_h, Ho_r, taps_w, base_w, Wo_r) in phase_info:
        if Ho_r == 0 or Wo_r == 0:
            continue
        if not taps_h or not taps_w:
            # No kernel tap lands on this output phase: bias-only output.
            hv = bh.astype(jnp.float32)
            if activation is not None:
                hv = activation(hv)
            const = (hv * jax.nn.sigmoid(bg.astype(jnp.float32))
                     ).reshape(1, 1, 1, C_out)
            out_nhwc = out_nhwc.at[:, rh::s, rw::s, :].set(
                jnp.broadcast_to(const, (N, Ho_r, Wo_r, C_out)))
            continue

        Th, Tw = len(taps_h), len(taps_w)
        K = Th * Tw * C_in

        # K blocking: single full-dim block for modest K; otherwise 128-multiple
        # tiles, preferring depth >= 256 for the 256-deep v6e/v7x MXU and
        # keeping the per-buffer fused-weight block small for v7x VMEM.
        w_block_budget = 4 << 20
        if K <= 1024 and K * two_c * 2 <= w_block_budget:
            K_pad, tile_k = K, K
        else:
            K_pad = _round_up(K, 128)
            cands = [t for t in (512, 384, 256, 128)
                     if K_pad % t == 0 and t * two_c * 2 <= w_block_budget]
            tile_k = cands[0] if cands else 128

        # Per-phase im2col of the *un-dilated* input restricted to this phase's
        # taps: K = Th*Tw*C_in instead of KH*KW*C_in (~s^2 fewer patch bytes).
        # Any K padding is folded into this single materializing concat.
        cols = [xp[:, base_h[kh] + pad_t: base_h[kh] + pad_t + Ho_r,
                   base_w[kw] + pad_l: base_w[kw] + pad_l + Wo_r, :]
                for kh in taps_h for kw in taps_w]
        if K_pad > K:
            cols.append(jnp.zeros((N, Ho_r, Wo_r, K_pad - K), jnp.bfloat16))
        M_rows = N * Ho_r * Wo_r
        patches = jnp.concatenate(cols, axis=-1).reshape(M_rows, K_pad)

        M_pad = _round_up(M_rows, 8)
        if M_pad != M_rows:                       # rare: keep sublane-aligned rows
            patches = jnp.pad(patches, ((0, M_pad - M_rows), (0, 0)))

        def _pad_w(wf):
            return jnp.pad(wf, ((0, K_pad - K), (0, c_out_pad - C_out)))
        w_cat = jnp.concatenate(
            [_pad_w(_flat_w(wh, taps_h, taps_w)),
             _pad_w(_flat_w(wg, taps_h, taps_w))], axis=1).astype(jnp.bfloat16)

        tile_m = _pick_tile_m(M_pad, tile_cap)
        while tile_m > 128 and not _fits_vmem(tile_m, tile_k, two_c, C_out,
                                              vmem_limit):
            tile_m = max(128, _round_up(tile_m // 2, 128))

        out2d = _fused_gated_matmul(
            patches, w_cat, b_cat, c_out=C_out, c_out_pad=c_out_pad,
            tile_m=tile_m, tile_k=tile_k, activation=activation,
            vmem_limit=vmem_limit)                # (M_pad, C_out) f32
        phase = out2d[:M_rows].reshape(N, Ho_r, Wo_r, C_out)
        out_nhwc = out_nhwc.at[:, rh::s, rw::s, :].set(phase)

    return jnp.transpose(out_nhwc, (0, 3, 1, 2))  # NCHW, matching the module


# ---------------------------------------------------------------------------
# Pure-JAX reference (XLA conv) for verification
# ---------------------------------------------------------------------------
def _ref_conv_transpose(x, w, b, stride, padding, output_padding, dilation):
    s, p, op, d = stride, padding, output_padding, dilation
    C_in, C_out, KH, KW = w.shape
    w_conv = jnp.transpose(w, (1, 0, 2, 3))[:, :, ::-1, ::-1]   # OIHW, flipped
    pad_h = (d * (KH - 1) - p, d * (KH - 1) - p + op)
    pad_w = (d * (KW - 1) - p, d * (KW - 1) - p + op)
    y = lax.conv_general_dilated(
        x, w_conv, window_strides=(1, 1), padding=[pad_h, pad_w],
        lhs_dilation=(s, s), rhs_dilation=(d, d),
        dimension_numbers=('NCHW', 'OIHW', 'NCHW'))
    return y + b[None, :, None, None]


def _ref_gated(x, wh, bh, wg, bg, stride, padding, output_padding, dilation):
    h = _ref_conv_transpose(x, wh, bh, stride, padding, output_padding, dilation)
    g = _ref_conv_transpose(x, wg, bg, stride, padding, output_padding, dilation)
    return h * jax.nn.sigmoid(g)


if __name__ == "__main__":
    key = jax.random.PRNGKey(0)
    N, C_in, H, W = 2, 4, 16, 16
    C_out, Ksz, stride, padding = 8, 4, 2, 1
    output_padding, dilation = 0, 1

    k1, k2, k3, k4, k5 = jax.random.split(key, 5)
    x = jax.random.normal(k1, (N, C_in, H, W), jnp.float32)
    wh = 0.1 * jax.random.normal(k2, (C_in, C_out, Ksz, Ksz), jnp.float32)
    bh = 0.1 * jax.random.normal(k3, (C_out,), jnp.float32)
    wg = 0.1 * jax.random.normal(k4, (C_in, C_out, Ksz, Ksz), jnp.float32)
    bg = 0.1 * jax.random.normal(k5, (C_out,), jnp.float32)

    out = gated_conv_transpose2d(
        x, (wh, bh, wg, bg), stride=stride, padding=padding,
        output_padding=output_padding, dilation=dilation, activation=None)
    out = jax.block_until_ready(out)

    # Reference 1: pure f32 (loose tolerance; kernel matmuls run in bf16).
    ref_f32 = _ref_gated(x, wh, bh, wg, bg, stride, padding,
                         output_padding, dilation)
    # Reference 2: inputs rounded through bf16 like the kernel (tight tolerance).
    bf = lambda a: a.astype(jnp.bfloat16).astype(jnp.float32)
    ref_bf = _ref_gated(bf(x), bf(wh), bh, bf(wg), bg,
                        stride, padding, output_padding, dilation)

    assert out.shape == ref_f32.shape, (out.shape, ref_f32.shape)
    err_f32 = float(jnp.max(jnp.abs(out - ref_f32)))
    err_bf = float(jnp.max(jnp.abs(out - ref_bf)))
    assert err_f32 < 3e-2, f"max abs error vs f32 ref too large: {err_f32}"
    assert err_bf < 5e-3, f"max abs error vs bf16-matched ref too large: {err_bf}"
    print("KERNEL_OK")
</pallas_src>

<mosaic_0001>
module attributes {stable_mosaic.version = 11 : i64} {
  func.func @_gated_matmul_kernel(%arg0: i32, %arg1: i32, %arg2: memref<256x16xbf16, #tpu.memory_space<vmem>>, %arg3: memref<16x256xbf16, #tpu.memory_space<vmem>>, %arg4: memref<1x256xf32, #tpu.memory_space<vmem>>, %arg5: memref<256x8xf32, #tpu.memory_space<vmem>>, %arg6: memref<256x256xf32, #tpu.memory_space<vmem>>) attributes {dimension_semantics = [#tpu.dimension_semantics<parallel>, #tpu.dimension_semantics<arbitrary>], iteration_bounds = array<i64: 2, 1>, scalar_prefetch = 0 : i64, scratch_operands = 1 : i64, tpu.core_type = #tpu.core_type<tc>, window_params = [{transform_indices = @transform_0, window_bounds = array<i64: 256, 16>}, {transform_indices = @transform_1, window_bounds = array<i64: 16, 256>}, {pipeline_mode = #tpu.pipeline_mode<synchronous>, transform_indices = @transform_2, window_bounds = array<i64: 1, 256>}, {transform_indices = @transform_3, window_bounds = array<i64: 256, 8>}]} {
    %c0_i32 = arith.constant 0 : i32
    %0 = arith.cmpi eq, %arg1, %c0_i32 : i32
    %1 = arith.extui %0 : i1 to i32
    %c0_i32_0 = arith.constant 0 : i32
    %2 = arith.cmpi ne, %1, %c0_i32_0 : i32
    scf.if %2 {
      %cst_10 = arith.constant 0.000000e+00 : f32
      %12 = vector.broadcast %cst_10 : f32 to vector<256x256xf32>
      %c0_11 = arith.constant 0 : index
      %c0_12 = arith.constant 0 : index
      %13 = vector.load %arg6[%c0_11, %c0_12] : memref<256x256xf32, #tpu.memory_space<vmem>>, vector<256x256xf32>
      tpu.vector_store %arg6[%c0_11, %c0_12], %12 {strides = array<i32>} : memref<256x256xf32, #tpu.memory_space<vmem>>, vector<256x256xf32>,
    } else {
    }
    %c0 = arith.constant 0 : index
    %c0_1 = arith.constant 0 : index
    %3 = vector.load %arg6[%c0, %c0_1] : memref<256x256xf32, #tpu.memory_space<vmem>>, vector<256x256xf32>
    %c0_2 = arith.constant 0 : index
    %c0_3 = arith.constant 0 : index
    %4 = vector.load %arg2[%c0_2, %c0_3] : memref<256x16xbf16, #tpu.memory_space<vmem>>, vector<256x16xbf16>
    %c0_4 = arith.constant 0 : index
    %c0_5 = arith.constant 0 : index
    %5 = vector.load %arg3[%c0_4, %c0_5] : memref<16x256xbf16, #tpu.memory_space<vmem>>, vector<16x256xbf16>
    %cst = arith.constant dense<0.000000e+00> : vector<256x256xf32>
    %6 = tpu.matmul %4, %5, %cst {dimension_numbers = #tpu.dot_dimension_numbers<[1], [0], [0], [1], [0, 0, 1, 1], [], []>} : vector<256x16xbf16>, vector<16x256xbf16>, vector<256x256xf32> -> vector<256x256xf32>
    %7 = arith.addf %3, %6 : vector<256x256xf32>
    %c0_6 = arith.constant 0 : index
    %c0_7 = arith.constant 0 : index
    %8 = vector.load %arg6[%c0_6, %c0_7] : memref<256x256xf32, #tpu.memory_space<vmem>>, vector<256x256xf32>
    tpu.vector_store %arg6[%c0_6, %c0_7], %7 {strides = array<i32>} : memref<256x256xf32, #tpu.memory_space<vmem>>, vector<256x256xf32>,
    %c0_i32_8 = arith.constant 0 : i32
    %9 = arith.cmpi eq, %arg1, %c0_i32_8 : i32
    %10 = arith.extui %9 : i1 to i32
    %c0_i32_9 = arith.constant 0 : i32
    %11 = arith.cmpi ne, %10, %c0_i32_9 : i32
    scf.if %11 {
      %c0_10 = arith.constant 0 : index
      %c0_11 = arith.constant 0 : index
      %12 = vector.load %arg6[%c0_10, %c0_11] : memref<256x256xf32, #tpu.memory_space<vmem>>, vector<256x256xf32>
      %c0_12 = arith.constant 0 : index
      %c0_13 = arith.constant 0 : index
      %13 = vector.load %arg4[%c0_12, %c0_13] : memref<1x256xf32, #tpu.memory_space<vmem>>, vector<1x256xf32>
      %14 = vector.broadcast %13 : vector<1x256xf32> to vector<256x256xf32>
      %15 = arith.addf %12, %14 : vector<256x256xf32>
      %16 = vector.extract_strided_slice %15 {offsets = [0, 0], sizes = [256, 128], strides = [1, 1]} : vector<256x256xf32> to vector<256x128xf32>
      %17 = vector.extract_strided_slice %15 {offsets = [0, 128], sizes = [256, 128], strides = [1, 1]} : vector<256x256xf32> to vector<256x128xf32>
      %18 = math.absf %17 : vector<256x128xf32>
      %cst_14 = arith.constant 0.000000e+00 : f32
      %19 = vector.broadcast %cst_14 : f32 to vector<256x128xf32>
      %20 = arith.subf %19, %18 : vector<256x128xf32>
      %21 = math.exp %20 : vector<256x128xf32>
      %cst_15 = arith.constant 1.000000e+00 : f32
      %22 = vector.broadcast %cst_15 : f32 to vector<256x128xf32>
      %23 = arith.addf %22, %21 : vector<256x128xf32>
      %24 = tpu.reciprocal %23 {approx = true} : vector<256x128xf32> -> vector<256x128xf32>
      %cst_16 = arith.constant 0.000000e+00 : f32
      %25 = vector.broadcast %cst_16 : f32 to vector<256x128xf32>
      %26 = arith.cmpf oge, %17, %25 : vector<256x128xf32>
      %cst_17 = arith.constant 1.000000e+00 : f32
      %27 = vector.broadcast %cst_17 : f32 to vector<256x128xf32>
      %28 = arith.subf %27, %24 : vector<256x128xf32>
      %29 = arith.select %26, %24, %28 : vector<256x128xi1>, vector<256x128xf32>
      %30 = arith.mulf %16, %29 : vector<256x128xf32>
      %31 = vector.extract_strided_slice %30 {offsets = [0, 0], sizes = [256, 8], strides = [1, 1]} : vector<256x128xf32> to vector<256x8xf32>
      %c0_18 = arith.constant 0 : index
      %c0_19 = arith.constant 0 : index
      %32 = vector.load %arg5[%c0_18, %c0_19] : memref<256x8xf32, #tpu.memory_space<vmem>>, vector<256x8xf32>
      tpu.vector_store %arg5[%c0_18, %c0_19], %31 {strides = array<i32>} : memref<256x8xf32, #tpu.memory_space<vmem>>, vector<256x8xf32>,
    } else {
    }
    return
  }
  func.func @transform_0(%arg0: i32, %arg1: i32) -> (i32, i32) {
    %c0_i32 = arith.constant 0 : i32
    return %arg0, %arg1 : i32, i32
  }
  func.func @transform_1(%arg0: i32, %arg1: i32) -> (i32, i32) {
    %c0_i32 = arith.constant 0 : i32
    %c0_i32_0 = arith.constant 0 : i32
    return %arg1, %c0_i32 : i32, i32
  }
  func.func @transform_2(%arg0: i32, %arg1: i32) -> (i32, i32) {
    %c0_i32 = arith.constant 0 : i32
    %c0_i32_0 = arith.constant 0 : i32
    %c0_i32_1 = arith.constant 0 : i32
    return %c0_i32, %c0_i32_0 : i32, i32
  }
  func.func @transform_3(%arg0: i32, %arg1: i32) -> (i32, i32) {
    %c0_i32 = arith.constant 0 : i32
    %c0_i32_0 = arith.constant 0 : i32
    return %arg0, %c0_i32 : i32, i32
  }
}

</mosaic_0001>

<bundles_post_ra>
// kernel: gated_conv_transpose2d.4
= control target key start
LH: loop header
LB: loop body
LE: loop exit
PB: predicated region body
PF: predicated region fallthrough
CT: control target
= control target key end

     0   :  { %s1693_s12 = smov 0   ;;  %s1695_s13 = smov 0   ;;  %s2208_s0 = inlined_call_operand.vmem [shape: bf16[512,16], index: 0, kind: input, shape index: {}]   ;;  %s2209_s1 = inlined_call_operand.vmem [shape: bf16[16,256], index: 1, kind: input, shape index: {}]   ;;  %s2210_s2 = inlined_call_operand.vmem [shape: f32[1,256], index: 2, kind: input, shape index: {}]   ;;  %s2211_s3 = inlined_call_operand.vmem [shape: f32[512,8], index: 3, kind: output, shape index: {}]  }
   0x1   :  { %s1697_s14 = smov 0  }
   0x2 LB: > { %s25_s15 = sadd.s32 1, %s1666_s13  ;;  %p1433_p0 = scmp.ge.s32.totalorder %s1670_s14, 1  ;;  %s1670_s14 = sphi %s1697_s14, %s13_s14   ;;  %s1666_s13 = sphi %s1695_s13, %s2213_s13   ;;  %s1662_s12 = sphi %s1693_s12, %s2212_s12  }
   0x3   : > { %p27_p1 = scmp.ge.s32.totalorder %s25_s15, 2  ;;  %p167_p2 = scmp.lt.s32.totalorder %s1670_s14, 3 }
   0x5   : > { %s2215_s15 = smov (%p27_p1, %s25_s15), 0  ;;  %p168_p3 = pnand %p1433_p0, %p167_p2 }
   0x6   : > { %s1434_s18 = sshll.u32 (!%p168_p3), %s1662_s12, 5 }
   0x7   : > { %171 = sbr.rel (%p168_p3) target bundleno = 337 (0x151), region = 32  ;;  %p201_p4 = scmp.lt.s32.totalorder (!%p168_p3), %s1434_s18, 63 }
   0xc   : > { %v1501_v0 = vld [vmem:[%s2209_s1 + $0x4] ss:$8 sps:$4 sm:$0xff]   ;;  %v1503_v1 = vld [vmem:[%s2209_s1] ss:$8 sps:$4 sm:$0xff]   ;;  %v1672_v2 = vmov 0   ;;  %s2217_s18 = smov (!%p201_p4, %s1434_s18), 63  ;;  %v918_v19 = vlaneseq }
   0xd   : > { %560 = vmatprep.mubr.bf16.mxu0 %v1672_v2  ;;  %640 = vmatprep.mubr.bf16.mxu1 %v1672_v2  ;;  %s1435_s21 = sshll.u32 %s2217_s18, 2  ;;  %vm479_vm0 = vcmask 130048   ;;  %v1763_v22 = vld [vmem:[%s2210_s2] sm:$0x3]  ;;  %vm1312_vm2 = vcmask 64512   ;;  %s1437_s27 = sshll.u32 %s2217_s18, 3 }
   0xe   : > { %542 = vmatprep.subr.bf16.mxu0 %v1501_v0  ;;  %1474 = vmatprep.subr.bf16.mxu1 %v1501_v0  ;;  %s1723_s24 = scalar_lea.vmem %s2208_s0, %s1435_s21  ;;  %v1757_v20 = vshrl.u32 %v918_v19, 7  ;;  %s1934_s30 = scalar_lea.vmem %s2211_s3, %s1437_s27 }
   0xf   : > { %543 = vmatpush1.bf16.msra.mxu0 %v1503_v1  ;;  %1475 = vmatpush1.bf16.msra.mxu1 %v1503_v1  ;;  %v1504_v3 = vld [vmem:[%s1723_s24] sm:$0xff]   ;;  %v1506_v5 = vld [vmem:[%s1723_s24 + $0x8] sm:$0xff]   ;;  %v1508_v7 = vld [vmem:[%s1723_s24 + $0x10] sm:$0xff]  }
  0x10   : > { %v1505_v4 = vld [vmem:[%s1723_s24 + $0x40] sm:$0xff]   ;;  %v1507_v6 = vld [vmem:[%s1723_s24 + $0x48] sm:$0xff]   ;;  %v1509_v8 = vld [vmem:[%s1723_s24 + $0x50] sm:$0xff]   ;;  %v924_v21 = vsub.s32 1, %v1757_v20  ;;  %v920_v19 = vsub.s32 0, %v1757_v20 }
  0x11   : > { %v1510_v9 = vld [vmem:[%s1723_s24 + $0x18] sm:$0xff]   ;;  %v1512_v11 = vld [vmem:[%s1723_s24 + $0x20] sm:$0xff]   ;;  %v1514_v13 = vld [vmem:[%s1723_s24 + $0x28] sm:$0xff]  }
  0x12   : > { %1456 = vmatmul.mubr.msk.bf16.vlgmr.msra.gmra.mxu0 %vm479_vm0, %v1504_v3  ;;  %1464 = vmatmul.mubr.msk.bf16.vlgmr.msra.gmra.mxu1 %vm479_vm0, %v1505_v4  ;;  %v1511_v10 = vld [vmem:[%s1723_s24 + $0x58] sm:$0xff]   ;;  %v1513_v12 = vld [vmem:[%s1723_s24 + $0x60] sm:$0xff]   ;;  %v1515_v14 = vld [vmem:[%s1723_s24 + $0x68] sm:$0xff]   ;;  %v1766_v23 = vrot.slane %v1763_v22, %v924_v21 }
  0x13   : > { %570 = vmatprep.mubr.bf16.mxu0 %v1672_v2  ;;  %650 = vmatprep.mubr.bf16.mxu1 %v1672_v2  ;;  %v1516_v15 = vld [vmem:[%s1723_s24 + $0x30] sm:$0xff]   ;;  %v1518_v17 = vld [vmem:[%s1723_s24 + $0x38] sm:$0xff]  }
  0x14   : > { %v1517_v16 = vld [vmem:[%s1723_s24 + $0x70] sm:$0xff]   ;;  %v1519_v18 = vld [vmem:[%s1723_s24 + $0x78] sm:$0xff]  }
  0x1a   : > { %1457 = vmatmul.mubr.msk.bf16.gmra.mxu0 %vm479_vm0, %v1506_v5  ;;  %1465 = vmatmul.mubr.msk.bf16.gmra.mxu1 %vm479_vm0, %v1507_v6 }
  0x1b   : > { %580 = vmatprep.mubr.bf16.mxu0 %v1672_v2  ;;  %660 = vmatprep.mubr.bf16.mxu1 %v1672_v2 }
  0x22   : > { %1458 = vmatmul.mubr.msk.bf16.gmra.mxu0 %vm479_vm0, %v1508_v7  ;;  %1466 = vmatmul.mubr.msk.bf16.gmra.mxu1 %vm479_vm0, %v1509_v8 }
  0x23   : > { %590 = vmatprep.mubr.bf16.mxu0 %v1672_v2  ;;  %670 = vmatprep.mubr.bf16.mxu1 %v1672_v2 }
  0x2a   : > { %1459 = vmatmul.mubr.msk.bf16.gmra.mxu0 %vm479_vm0, %v1510_v9  ;;  %1467 = vmatmul.mubr.msk.bf16.gmra.mxu1 %vm479_vm0, %v1511_v10 }
  0x2b   : > { %600 = vmatprep.mubr.bf16.mxu0 %v1672_v2  ;;  %680 = vmatprep.mubr.bf16.mxu1 %v1672_v2 }
  0x32   : > { %1460 = vmatmul.mubr.msk.bf16.gmra.mxu0 %vm479_vm0, %v1512_v11  ;;  %1468 = vmatmul.mubr.msk.bf16.gmra.mxu1 %vm479_vm0, %v1513_v12 }
  0x33   : > { %610 = vmatprep.mubr.bf16.mxu0 %v1672_v2  ;;  %690 = vmatprep.mubr.bf16.mxu1 %v1672_v2 }
  0x3a   : > { %1461 = vmatmul.mubr.msk.bf16.gmra.mxu0 %vm479_vm0, %v1514_v13  ;;  %1469 = vmatmul.mubr.msk.bf16.gmra.mxu1 %vm479_vm0, %v1515_v14 }
  0x3b   : > { %620 = vmatprep.mubr.bf16.mxu0 %v1672_v2  ;;  %700 = vmatprep.mubr.bf16.mxu1 %v1672_v2 }
  0x42   : > { %1462 = vmatmul.mubr.msk.bf16.gmra.mxu0 %vm479_vm0, %v1516_v15  ;;  %1470 = vmatmul.mubr.msk.bf16.gmra.mxu1 %vm479_vm0, %v1517_v16 }
  0x43   : > { %630 = vmatprep.mubr.bf16.mxu0 %v1672_v2  ;;  %710 = vmatprep.mubr.bf16.mxu1 %v1672_v2 }
  0x4a   : > { %1463 = vmatmul.mubr.msk.bf16.gmra.mxu0 %vm479_vm0, %v1518_v17  ;;  %1471 = vmatmul.mubr.msk.bf16.gmra.mxu1 %vm479_vm0, %v1519_v18 }
  0xd2   : > { %v1768_v24 = vpop.f32.mrf.mxu0  ;;  %v1770_v25 = vpop.f32.mrf.mxu1 }
  0xd4   : > { %v564_v26 = vpop.f32.mrf.mxu0  ;;  %v644_v28 = vpop.f32.mrf.mxu1 }
  0xd5   : > { %v1773_v27 = vadd.f32 %v1766_v23, %v564_v26  ;;  %v1776_v29 = vadd.f32 %v1766_v23, %v644_v28 }
  0xd6   : > { %v1778_v30 = vpop.f32.mrf.mxu0  ;;  %v1781_v32 = vpop.f32.mrf.mxu1 }
  0xd7   : > { %v992_v31 = vand.u32 2147483647, %v1773_v27  ;;  %v1008_v33 = vand.u32 2147483647, %v1776_v29  ;;  %vm1184_vm1 = vcmp.ge.f32.partialorder %v1773_v27, 0.0  ;;  %vm1200_vm3 = vcmp.ge.f32.partialorder %v1776_v29, 0.0 }
  0xd8   : > { %v568_v34 = vpop.f32.mrf.mxu0  ;;  %v648_v37 = vpop.f32.mrf.mxu1 }
  0xd9   : > { %v1024_v35 = vsub.f32 0.0, %v992_v31  ;;  %v1785_v36 = vadd.f32 %v1766_v23, %v568_v34  ;;  %v1040_v38 = vsub.f32 0.0, %v1008_v33  ;;  %v1788_v39 = vadd.f32 %v1766_v23, %v648_v37 }
  0xda   : > { %v1790_v40 = vpop.f32.mrf.mxu0  ;;  %v1793_v43 = vpop.f32.mrf.mxu1 }
  0xdb   : > { %v1056_v41 = vmul.f32 1.442695, %v1024_v35  ;;  %v993_v42 = vand.u32 2147483647, %v1785_v36  ;;  %v1088_v44 = vmul.f32 1.442695, %v1040_v38 }
  0xdc   : > { %v1009_v45 = vand.u32 2147483647, %v1788_v39  ;;  %v574_v46 = vpop.f32.mrf.mxu0  ;;  %v654_v49 = vpop.f32.mrf.mxu1  ;;  %vm1185_vm4 = vcmp.ge.f32.partialorder %v1785_v36, 0.0  ;;  %vm1201_vm5 = vcmp.ge.f32.partialorder %v1788_v39, 0.0 }
  0xdd   : > { %1520 = vpow2.f32 %v1056_v41  ;;  %v1025_v47 = vsub.f32 0.0, %v993_v42  ;;  %v1797_v48 = vadd.f32 %v1766_v23, %v574_v46  ;;  %v1800_v51 = vadd.f32 %v1766_v23, %v654_v49 }
  0xde   : > { %1522 = vpow2.f32 %v1088_v44  ;;  %v1041_v50 = vsub.f32 0.0, %v1009_v45  ;;  %v1802_v52 = vpop.f32.mrf.mxu0  ;;  %v1805_v55 = vpop.f32.mrf.mxu1  ;;  %v1846_v49 = vrot.slane %v1763_v22, %v920_v19 }
  0xdf   : > { %v1058_v53 = vmul.f32 1.442695, %v1025_v47  ;;  %v994_v54 = vand.u32 2147483647, %v1797_v48  ;;  %v1010_v57 = vand.u32 2147483647, %v1800_v51 }
  0xe0   : > { %v1090_v56 = vmul.f32 1.442695, %v1041_v50  ;;  %v578_v58 = vpop.f32.mrf.mxu0  ;;  %v658_v61 = vpop.f32.mrf.mxu1  ;;  %vm1186_vm6 = vcmp.ge.f32.partialorder %v1797_v48, 0.0  ;;  %vm1202_vm7 = vcmp.ge.f32.partialorder %v1800_v51, 0.0 }
  0xe1   : > { %1524 = vpow2.f32 %v1058_v53  ;;  %v1026_v59 = vsub.f32 0.0, %v994_v54  ;;  %v1809_v60 = vadd.f32 %v1766_v23, %v578_v58  ;;  %v1042_v62 = vsub.f32 0.0, %v1010_v57 }
  0xe2   : > { %1526 = vpow2.f32 %v1090_v56  ;;  %v1812_v63 = vadd.f32 %v1766_v23, %v658_v61  ;;  %v1814_v0 = vpop.f32.mrf.mxu0  ;;  %v1817_v3 = vpop.f32.mrf.mxu1 }
  0xe3   : > { %v1060_v1 = vmul.f32 1.442695, %v1026_v59  ;;  %v995_v2 = vand.u32 2147483647, %v1809_v60  ;;  %v1092_v4 = vmul.f32 1.442695, %v1042_v62  ;;  %v1955_v29 = vadd.f32 %v1846_v49, %v1814_v0 }
  0xe4   : > { %v1011_v5 = vand.u32 2147483647, %v1812_v63  ;;  %v584_v6 = vpop.f32.mrf.mxu0  ;;  %v664_v9 = vpop.f32.mrf.mxu1  ;;  %vm1187_vm8 = vcmp.ge.f32.partialorder %v1809_v60, 0.0  ;;  %vm1203_vm9 = vcmp.ge.f32.partialorder %v1812_v63, 0.0 }
  0xe5   : > { %1528 = vpow2.f32 %v1060_v1  ;;  %v1027_v7 = vsub.f32 0.0, %v995_v2  ;;  %v1821_v8 = vadd.f32 %v1766_v23, %v584_v6  ;;  %v1824_v11 = vadd.f32 %v1766_v23, %v664_v9 }
  0xe6   : > { %1530 = vpow2.f32 %v1092_v4  ;;  %v1043_v10 = vsub.f32 0.0, %v1011_v5  ;;  %v1826_v12 = vpop.f32.mrf.mxu0  ;;  %v1829_v15 = vpop.f32.mrf.mxu1 }
  0xe7   : > { %v1062_v13 = vmul.f32 1.442695, %v1027_v7  ;;  %v996_v14 = vand.u32 2147483647, %v1821_v8  ;;  %v1012_v17 = vand.u32 2147483647, %v1824_v11  ;;  %v1861_v7 = vadd.f32 %v1846_v49, %v1768_v24 }
  0xe8   : > { %v1094_v16 = vmul.f32 1.442695, %v1043_v10  ;;  %v588_v18 = vpop.f32.mrf.mxu0  ;;  %v668_v28 = vpop.f32.mrf.mxu1  ;;  %vm1188_vm10 = vcmp.ge.f32.partialorder %v1821_v8, 0.0  ;;  %vm1204_vm11 = vcmp.ge.f32.partialorder %v1824_v11, 0.0 }
  0xe9   : > { %1532 = vpow2.f32 %v1062_v13  ;;  %v1028_v21 = vsub.f32 0.0, %v996_v14  ;;  %v1834_v26 = vadd.f32 %v1766_v23, %v588_v18  ;;  %v1044_v33 = vsub.f32 0.0, %v1012_v17 }
  0xea   : > { %v1521_v31 = vpop.eup %1520  ;;  %1534 = vpow2.f32 %v1094_v16  ;;  %v1837_v34 = vadd.f32 %v1766_v23, %v668_v28  ;;  %v1839_v35 = vpop.f32.mrf.mxu0  ;;  %v1866_v14 = vadd.f32 %v1846_v49, %v1770_v25 }
  0xeb   : > { %v1523_v37 = vpop.eup %1522  ;;  %v1120_v38 = vadd.f32 1.0, %v1521_v31  ;;  %v1064_v41 = vmul.f32 1.442695, %v1028_v21  ;;  %v997_v42 = vand.u32 2147483647, %v1834_v26  ;;  %v1842_v20 = vpop.f32.mrf.mxu1  ;;  %vm1189_vm12 = vcmp.ge.f32.partialorder %v1834_v26, 0.0 }
  0xec   : > { %v1136_v44 = vadd.f32 1.0, %v1523_v37  ;;  %v1096_v45 = vmul.f32 1.442695, %v1044_v33  ;;  %v1013_v46 = vand.u32 2147483647, %v1837_v34  ;;  %v594_v47 = vpop.f32.mrf.mxu0  ;;  %vm1205_vm13 = vcmp.ge.f32.partialorder %v1837_v34, 0.0 }
  0xed   : > { %1536 = vrcp.f32 %v1120_v38  ;;  %v1029_v50 = vsub.f32 0.0, %v997_v42  ;;  %v674_v53 = vpop.f32.mrf.mxu1  ;;  %v1849_v57 = vadd.f32 %v1766_v23, %v594_v47  ;;  %v1888_v47 = vadd.f32 %v1846_v49, %v1781_v32 }
  0xee   : > { %v1525_v54 = vpop.eup %1524  ;;  %1538 = vrcp.f32 %v1136_v44  ;;  %v1045_v56 = vsub.f32 0.0, %v1013_v46  ;;  %v1852_v58 = vadd.f32 %v1766_v23, %v674_v53  ;;  %v1854_v59 = vpop.f32.mrf.mxu0 }
  0xef   : > { %v1527_v61 = vpop.eup %1526  ;;  %v1121_v62 = vadd.f32 1.0, %v1525_v54  ;;  %1540 = vpow2.f32 %v1064_v41  ;;  %v1066_v1 = vmul.f32 1.442695, %v1029_v50  ;;  %v1856_v22 = vpop.f32.mrf.mxu1  ;;  %v998_v5 = vand.u32 2147483647, %v1849_v57 }
  0xf0   : > { %v1137_v2 = vadd.f32 1.0, %v1527_v61  ;;  %1542 = vpow2.f32 %v1096_v45  ;;  %v1098_v4 = vmul.f32 1.442695, %v1045_v56  ;;  %v598_v6 = vpop.f32.mrf.mxu0  ;;  %v1014_v9 = vand.u32 2147483647, %v1852_v58 }
  0xf1   : > { %1544 = vrcp.f32 %v1121_v62  ;;  %v678_v10 = vpop.f32.mrf.mxu1  ;;  %v1030_v16 = vsub.f32 0.0, %v998_v5  ;;  %v1869_v17 = vadd.f32 %v1766_v23, %v598_v6  ;;  %v1882_v41 = vadd.f32 %v1846_v49, %v1778_v30 }
  0xf2   : > { %v1529_v13 = vpop.eup %1528  ;;  %1546 = vrcp.f32 %v1137_v2  ;;  %v1871_v18 = vpop.f32.mrf.mxu0  ;;  %v1046_v24 = vsub.f32 0.0, %v1014_v9  ;;  %v1874_v28 = vadd.f32 %v1766_v23, %v678_v10  ;;  %v1894_v30 = vadd.f32 %v1846_v49, %v1790_v40 }
  0xf3   : > { %v1531_v19 = vpop.eup %1530  ;;  %v1122_v21 = vadd.f32 1.0, %v1529_v13  ;;  %1548 = vpow2.f32 %v1066_v1  ;;  %v1876_v31 = vpop.f32.mrf.mxu1  ;;  %v1068_v33 = vmul.f32 1.442695, %v1030_v16  ;;  %v999_v37 = vand.u32 2147483647, %v1869_v17 }
  0xf4   : > { %v1138_v25 = vadd.f32 1.0, %v1531_v19  ;;  %1550 = vpow2.f32 %v1098_v4  ;;  %v604_v38 = vpop.f32.mrf.mxu0  ;;  %v1100_v42 = vmul.f32 1.442695, %v1046_v24  ;;  %v1015_v44 = vand.u32 2147483647, %v1874_v28 }
  0xf5   : > { %1552 = vrcp.f32 %v1122_v21  ;;  %v684_v45 = vpop.f32.mrf.mxu1  ;;  %v1031_v50 = vsub.f32 0.0, %v999_v37  ;;  %v1900_v2 = vadd.f32 %v1766_v23, %v604_v38  ;;  %v1909_v10 = vadd.f32 %v1846_v49, %v1793_v43 }
  0xf6   : > { %v1533_v46 = vpop.eup %1532  ;;  %1554 = vrcp.f32 %v1138_v25  ;;  %v1890_v53 = vpop.f32.mrf.mxu0  ;;  %v1047_v61 = vsub.f32 0.0, %v1015_v44  ;;  %v1904_v5 = vadd.f32 %v1766_v23, %v684_v45  ;;  %v1913_v13 = vadd.f32 %v1846_v49, %v1802_v52 }
  0xf7   : > { %v1535_v54 = vpop.eup %1534  ;;  %v1123_v56 = vadd.f32 1.0, %v1533_v46  ;;  %1556 = vpow2.f32 %v1068_v33  ;;  %v1896_v62 = vpop.f32.mrf.mxu1  ;;  %v1070_v32 = vmul.f32 1.442695, %v1031_v50  ;;  %v1000_v16 = vand.u32 2147483647, %v1900_v2 }
  0xf8   : > { %v1139_v1 = vadd.f32 1.0, %v1535_v54  ;;  %1558 = vpow2.f32 %v1100_v42  ;;  %v608_v4 = vpop.f32.mrf.mxu0  ;;  %v1102_v40 = vmul.f32 1.442695, %v1047_v61  ;;  %v1920_v25 = vadd.f32 %v1846_v49, %v1805_v55 }
  0xf9   : > { %1560 = vrcp.f32 %v1123_v56  ;;  %v688_v6 = vpop.f32.mrf.mxu1  ;;  %v1016_v33 = vand.u32 2147483647, %v1904_v5  ;;  %v1032_v52 = vsub.f32 0.0, %v1000_v16  ;;  %v1927_v42 = vadd.f32 %v1766_v23, %v608_v4 }
  0xfa   : > { %v1537_v9 = vpop.eup %1536  ;;  %1562 = vrcp.f32 %v1139_v1  ;;  %v1916_v19 = vpop.f32.mrf.mxu0  ;;  %v1940_v54 = vadd.f32 %v1766_v23, %v688_v6  ;;  %vm1190_vm14 = vcmp.ge.f32.partialorder %v1849_v57, 0.0  ;;  %vm1206_vm15 = vcmp.ge.f32.partialorder %v1852_v58, 0.0 }
  0xfb   : > { %v1539_v21 = vpop.eup %1538  ;;  %v1216_v24 = vsub.f32 1.0, %v1537_v9  ;;  %1564 = vpow2.f32 %v1070_v32  ;;  %v1923_v43 = vpop.f32.mrf.mxu1  ;;  %v1048_v50 = vsub.f32 0.0, %v1016_v33  ;;  %vm1191_vm0 = vcmp.ge.f32.partialorder %v1869_v17, 0.0 }
  0xfc   : > { %v1541_v37 = vpop.eup %1540  ;;  %v1232_v38 = vsub.f32 1.0, %v1539_v21  ;;  %1566 = vpow2.f32 %v1102_v40  ;;  %v1929_v44 = vpop.f32.mrf.mxu0  ;;  %v1072_v40 = vmul.f32 1.442695, %v1032_v52 }
  0xfd   : > { %v1543_v45 = vpop.eup %1542  ;;  %v1248_v55 = vsel %vm1184_vm1, %v1537_v9, %v1216_v24  ;;  %v1124_v46 = vadd.f32 1.0, %v1541_v37  ;;  %v1942_v56 = vpop.f32.mrf.mxu1  ;;  %v1104_v24 = vmul.f32 1.442695, %v1048_v50  ;;  %vm1207_vm1 = vcmp.ge.f32.partialorder %v1874_v28, 0.0 }
  0xfe   : > { %v1545_v61 = vpop.eup %1544  ;;  %v1280_v1 = vmul.f32 %v1248_v55, %v1861_v7  ;;  %v1264_v32 = vsel %vm1200_vm3, %v1539_v21, %v1232_v38  ;;  %v1140_v4 = vadd.f32 1.0, %v1543_v45  ;;  %v1948_v33 = vpop.f32.mrf.mxu0  ;;  %v1001_v7 = vand.u32 2147483647, %v1927_v42 }
  0xff   : > { %v1547_v27 = vpop.eup %1546  ;;  %v1296_v9 = vmul.f32 %v1264_v32, %v1866_v14  ;;  %v1217_v16 = vsub.f32 1.0, %v1545_v61  ;;  %1568 = vrcp.f32 %v1124_v46  ;;  %v1958_v21 = vpop.f32.mrf.mxu1  ;;  %v1017_v45 = vand.u32 2147483647, %v1940_v54 }
 0x100   : > { %v1549_v6 = vpop.eup %1548  ;;  %1313 = vst.msk [vmem:[%s1934_s30] sm:$0xff] %vm1312_vm2, %v1280_v1  ;;  %v1233_v37 = vsub.f32 1.0, %v1547_v27  ;;  %1570 = vrcp.f32 %v1140_v4  ;;  %v1033_v36 = vsub.f32 0.0, %v1001_v7  ;;  %vm1192_vm3 = vcmp.ge.f32.partialorder %v1900_v2, 0.0 }
 0x101   : > { %v1551_v14 = vpop.eup %1550  ;;  %1329 = vst.msk [vmem:[%s1934_s30 + $0x80] sm:$0xff] %vm1312_vm2, %v1296_v9  ;;  %v1249_v38 = vsel %vm1185_vm4, %v1545_v61, %v1217_v16  ;;  %v1125_v52 = vadd.f32 1.0, %v1549_v6  ;;  %1572 = vpow2.f32 %v1072_v40  ;;  %v618_v61 = vpop.f32.mrf.mxu0  ;;  %vm1208_vm4 = vcmp.ge.f32.partialorder %v1904_v5, 0.0 }
 0x102   : > { %v1553_v55 = vpop.eup %1552  ;;  %v1281_v0 = vmul.f32 %v1249_v38, %v1882_v41  ;;  %v1265_v46 = vsel %vm1201_vm5, %v1547_v27, %v1233_v37  ;;  %v1141_v50 = vadd.f32 1.0, %v1551_v14  ;;  %1574 = vpow2.f32 %v1104_v24  ;;  %v698_v39 = vpop.f32.mrf.mxu1 }
 0x103   : > { %v1555_v1 = vpop.eup %1554  ;;  %v1297_v32 = vmul.f32 %v1265_v46, %v1888_v47  ;;  %v1218_v4 = vsub.f32 1.0, %v1553_v55  ;;  %1576 = vrcp.f32 %v1125_v52  ;;  %v1049_v41 = vsub.f32 0.0, %v1017_v45 }
 0x104   : > { %v1557_v9 = vpop.eup %1556  ;;  %1314 = vst.msk [vmem:[%s1934_s30 + $0x8] sm:$0xff] %vm1312_vm2, %v1281_v0  ;;  %v1234_v40 = vsub.f32 1.0, %v1555_v1  ;;  %1578 = vrcp.f32 %v1141_v50  ;;  %v1978_v47 = vadd.f32 %v1846_v49, %v1817_v3  ;;  %v1074_v6 = vmul.f32 1.442695, %v1033_v36  ;;  %v1989_v0 = vpop.f32.mrf.mxu0 }
 0x105   : > { %v1559_v27 = vpop.eup %1558  ;;  %1330 = vst.msk [vmem:[%s1934_s30 + $0x88] sm:$0xff] %vm1312_vm2, %v1297_v32  ;;  %v1250_v16 = vsel %vm1186_vm6, %v1553_v55, %v1218_v4  ;;  %v1126_v24 = vadd.f32 1.0, %v1557_v9  ;;  %v1106_v52 = vmul.f32 1.442695, %v1049_v41  ;;  %v1987_v3 = vadd.f32 %v1846_v49, %v1826_v12  ;;  %v2001_v50 = vpop.f32.mrf.mxu1 }
 0x106   : > { %v1561_v37 = vpop.eup %1560  ;;  %v1282_v7 = vmul.f32 %v1250_v16, %v1894_v30  ;;  %v1266_v14 = vsel %vm1202_vm7, %v1555_v1, %v1234_v40  ;;  %v1142_v38 = vadd.f32 1.0, %v1559_v27  ;;  %v1995_v46 = vadd.f32 %v1766_v23, %v1929_v44  ;;  %v624_v40 = vpop.f32.mrf.mxu0 }
 0x107   : > { %v1563_v48 = vpop.eup %1562  ;;  %v1298_v45 = vmul.f32 %v1266_v14, %v1909_v10  ;;  %v1219_v55 = vsub.f32 1.0, %v1561_v37  ;;  %1580 = vrcp.f32 %v1126_v24  ;;  %v1999_v10 = vadd.f32 %v1766_v23, %v1942_v56 }
 0x108   : > { %v1565_v30 = vpop.eup %1564  ;;  %1315 = vst.msk [vmem:[%s1934_s30 + $0x10] sm:$0xff] %vm1312_vm2, %v1282_v7  ;;  %v1235_v51 = vsub.f32 1.0, %v1563_v48  ;;  %1582 = vrcp.f32 %v1142_v38  ;;  %v970_v9 = vadd.f32 %v1846_v49, %v1829_v15  ;;  %v1002_v60 = vand.u32 2147483647, %v1995_v46 }
 0x109   : > { %v1567_v12 = vpop.eup %1566  ;;  %1331 = vst.msk [vmem:[%s1934_s30 + $0x90] sm:$0xff] %vm1312_vm2, %v1298_v45  ;;  %v1251_v1 = vsel %vm1187_vm8, %v1561_v37, %v1219_v55  ;;  %v1127_v32 = vadd.f32 1.0, %v1565_v30  ;;  %1584 = vpow2.f32 %v1074_v6  ;;  %v1018_v63 = vand.u32 2147483647, %v1999_v10 }
 0x10a   : > { %v1283_v44 = vmul.f32 %v1251_v1, %v1913_v13  ;;  %v1267_v4 = vsel %vm1203_vm9, %v1563_v48, %v1235_v51  ;;  %v1143_v56 = vadd.f32 1.0, %v1567_v12  ;;  %1586 = vpow2.f32 %v1106_v52  ;;  %v704_v13 = vpop.f32.mrf.mxu1 }
 0x10b   : > { %v1299_v36 = vmul.f32 %v1267_v4, %v1920_v25  ;;  %1588 = vrcp.f32 %v1127_v32  ;;  %v940_v15 = vadd.f32 %v1846_v49, %v1839_v35  ;;  %v1034_v16 = vsub.f32 0.0, %v1002_v60 }
 0x10c   : > { %v1569_v41 = vpop.eup %1568  ;;  %1316 = vst.msk [vmem:[%s1934_s30 + $0x18] sm:$0xff] %vm1312_vm2, %v1283_v44  ;;  %1590 = vrcp.f32 %v1143_v56  ;;  %v2025_v24 = vadd.f32 %v1766_v23, %v618_v61  ;;  %v972_v7 = vadd.f32 %v1846_v49, %v1842_v20  ;;  %v1050_v14 = vsub.f32 0.0, %v1018_v63  ;;  %v2035_v61 = vpop.f32.mrf.mxu0 }
 0x10d   : > { %v1571_v27 = vpop.eup %1570  ;;  %1332 = vst.msk [vmem:[%s1934_s30 + $0x98] sm:$0xff] %vm1312_vm2, %v1299_v36  ;;  %v1220_v25 = vsub.f32 1.0, %v1569_v41  ;;  %v2030_v38 = vadd.f32 %v1766_v23, %v698_v39  ;;  %v1076_v35 = vmul.f32 1.442695, %v1034_v16  ;;  %v2040_v1 = vpop.f32.mrf.mxu1  ;;  %v942_v36 = vadd.f32 %v1846_v49, %v1854_v59 }
 0x10e   : > { %v1573_v6 = vpop.eup %1572  ;;  %v1236_v37 = vsub.f32 1.0, %v1571_v27  ;;  %v1003_v55 = vand.u32 2147483647, %v2025_v24  ;;  %v1108_v12 = vmul.f32 1.442695, %v1050_v14  ;;  %v628_v60 = vpop.f32.mrf.mxu0  ;;  %v2063_v34 = vadd.f32 %v1766_v23, %v704_v13 }
 0x10f   : > { %v1575_v52 = vpop.eup %1574  ;;  %v1252_v48 = vsel %vm1188_vm10, %v1569_v41, %v1220_v25  ;;  %v1128_v45 = vadd.f32 1.0, %v1573_v6  ;;  %v1019_v11 = vand.u32 2147483647, %v2030_v38  ;;  %v708_v25 = vpop.f32.mrf.mxu1  ;;  %v946_v5 = vadd.f32 %v1846_v49, %v1890_v53 }
 0x110   : > { %v1577_v30 = vpop.eup %1576  ;;  %v1284_v51 = vmul.f32 %v1252_v48, %v1955_v29  ;;  %v1268_v20 = vsel %vm1204_vm11, %v1571_v27, %v1236_v37  ;;  %v1144_v39 = vadd.f32 1.0, %v1575_v52  ;;  %v1035_v4 = vsub.f32 0.0, %v1003_v55  ;;  %v2072_v55 = vpop.f32.mrf.mxu0 }
 0x111   : > { %v1579_v8 = vpop.eup %1578  ;;  %v1300_v32 = vmul.f32 %v1268_v20, %v1978_v47  ;;  %v1221_v44 = vsub.f32 1.0, %v1577_v30  ;;  %1592 = vrcp.f32 %v1128_v45  ;;  %v1051_v27 = vsub.f32 0.0, %v1019_v11  ;;  %v2074_v20 = vpop.f32.mrf.mxu1 }
 0x112   : > { %1317 = vst.msk [vmem:[%s1934_s30 + $0x20] sm:$0xff] %vm1312_vm2, %v1284_v51  ;;  %v1237_v56 = vsub.f32 1.0, %v1579_v8  ;;  %1594 = vrcp.f32 %v1144_v39  ;;  %v1078_v47 = vmul.f32 1.442695, %v1035_v4  ;;  %v2057_v37 = vadd.f32 %v1766_v23, %v624_v40  ;;  %v634_v4 = vpop.f32.mrf.mxu0 }
 0x113   : > { %1333 = vst.msk [vmem:[%s1934_s30 + $0xa0] sm:$0xff] %vm1312_vm2, %v1300_v32  ;;  %v1253_v29 = vsel %vm1189_vm12, %v1577_v30, %v1221_v44  ;;  %1596 = vpow2.f32 %v1076_v35  ;;  %v1110_v52 = vmul.f32 1.442695, %v1051_v27  ;;  %v974_v40 = vadd.f32 %v1846_v49, %v1856_v22 }
 0x114   : > { %v1581_v41 = vpop.eup %1580  ;;  %v1285_v63 = vmul.f32 %v1253_v29, %v1987_v3  ;;  %v1269_v59 = vsel %vm1205_vm13, %v1579_v8, %v1237_v56  ;;  %1598 = vpow2.f32 %v1108_v12  ;;  %v1004_v35 = vand.u32 2147483647, %v2057_v37 }
 0x115   : > { %v1583_v16 = vpop.eup %1582  ;;  %v1301_v6 = vmul.f32 %v1269_v59, %v970_v9  ;;  %v1222_v26 = vsub.f32 1.0, %v1581_v41  ;;  %1600 = vpow2.f32 %v1078_v47  ;;  %v1020_v32 = vand.u32 2147483647, %v2063_v34  ;;  %v714_v47 = vpop.f32.mrf.mxu1 }
 0x116   : > { %v1585_v14 = vpop.eup %1584  ;;  %1318 = vst.msk [vmem:[%s1934_s30 + $0x28] sm:$0xff] %vm1312_vm2, %v1285_v63  ;;  %v1238_v3 = vsub.f32 1.0, %v1583_v16  ;;  %1602 = vpow2.f32 %v1110_v52  ;;  %v1036_v8 = vsub.f32 0.0, %v1004_v35  ;;  %v2087_v17 = vadd.f32 %v1766_v23, %v708_v25 }
 0x117   : > { %v1587_v48 = vpop.eup %1586  ;;  %1334 = vst.msk [vmem:[%s1934_s30 + $0xa8] sm:$0xff] %vm1312_vm2, %v1301_v6  ;;  %v1254_v9 = vsel %vm1190_vm14, %v1581_v41, %v1222_v26  ;;  %v1129_v45 = vadd.f32 1.0, %v1585_v14  ;;  %v1052_v29 = vsub.f32 0.0, %v1020_v32  ;;  %v944_v63 = vadd.f32 %v1846_v49, %v1871_v18  ;;  %v2104_v26 = vpop.f32.mrf.mxu0 }
 0x118   : > { %v1589_v58 = vpop.eup %1588  ;;  %v1286_v30 = vmul.f32 %v1254_v9, %v940_v15  ;;  %v1270_v13 = vsel %vm1206_vm15, %v1583_v16, %v1238_v3  ;;  %v1145_v51 = vadd.f32 1.0, %v1587_v48  ;;  %v1080_v44 = vmul.f32 1.442695, %v1036_v8  ;;  %v2109_v48 = vpop.f32.mrf.mxu1 }
 0x119   : > { %v1591_v39 = vpop.eup %1590  ;;  %v1302_v57 = vmul.f32 %v1270_v13, %v972_v7  ;;  %v1223_v12 = vsub.f32 1.0, %v1589_v58  ;;  %1604 = vrcp.f32 %v1129_v45  ;;  %v2084_v7 = vadd.f32 %v1766_v23, %v628_v60  ;;  %v638_v32 = vpop.f32.mrf.mxu0 }
 0x11a   : > { %1319 = vst.msk [vmem:[%s1934_s30 + $0x30] sm:$0xff] %vm1312_vm2, %v1286_v30  ;;  %v1239_v22 = vsub.f32 1.0, %v1591_v39  ;;  %1606 = vrcp.f32 %v1145_v51  ;;  %v1112_v60 = vmul.f32 1.442695, %v1052_v29  ;;  %v1021_v27 = vand.u32 2147483647, %v2087_v17 }
 0x11b   : > { %1335 = vst.msk [vmem:[%s1934_s30 + $0xb0] sm:$0xff] %vm1312_vm2, %v1302_v57  ;;  %v1255_v15 = vsel %vm1191_vm0, %v1589_v58, %v1223_v12  ;;  %1608 = vpow2.f32 %v1080_v44  ;;  %v1005_v28 = vand.u32 2147483647, %v2084_v7  ;;  %v2102_v6 = vadd.f32 %v1766_v23, %v634_v4 }
 0x11c   : > { %v1287_v56 = vmul.f32 %v1255_v15, %v942_v36  ;;  %v1271_v11 = vsel %vm1207_vm1, %v1591_v39, %v1239_v22  ;;  %v976_v36 = vadd.f32 %v1846_v49, %v1876_v31  ;;  %1610 = vpow2.f32 %v1112_v60  ;;  %v718_v15 = vpop.f32.mrf.mxu1 }
 0x11d   : > { %v1303_v41 = vmul.f32 %v1271_v11, %v974_v40  ;;  %v1037_v18 = vsub.f32 0.0, %v1005_v28  ;;  %v1053_v31 = vsub.f32 0.0, %v1021_v27  ;;  %v2107_v52 = vadd.f32 %v1766_v23, %v714_v47 }
 0x11e   : > { %v1593_v59 = vpop.eup %1592  ;;  %1320 = vst.msk [vmem:[%s1934_s30 + $0x38] sm:$0xff] %vm1312_vm2, %v1287_v56  ;;  %v1006_v58 = vand.u32 2147483647, %v2102_v6  ;;  %v978_v4 = vadd.f32 %v1846_v49, %v1896_v62  ;;  %vm1193_vm5 = vcmp.ge.f32.partialorder %v1927_v42, 0.0  ;;  %vm1209_vm6 = vcmp.ge.f32.partialorder %v1940_v54, 0.0 }
 0x11f   : > { %v1595_v25 = vpop.eup %1594  ;;  %1336 = vst.msk [vmem:[%s1934_s30 + $0xb8] sm:$0xff] %vm1312_vm2, %v1303_v41  ;;  %v1224_v16 = vsub.f32 1.0, %v1593_v59  ;;  %v1082_v35 = vmul.f32 1.442695, %v1037_v18  ;;  %v1114_v57 = vmul.f32 1.442695, %v1053_v31  ;;  %v2126_v41 = vadd.f32 %v1766_v23, %v638_v32 }
 0x120   : > { %v1597_v14 = vpop.eup %1596  ;;  %v1240_v3 = vsub.f32 1.0, %v1595_v25  ;;  %v1038_v22 = vsub.f32 0.0, %v1006_v58  ;;  %v1022_v2 = vand.u32 2147483647, %v2107_v52  ;;  %vm1194_vm7 = vcmp.ge.f32.partialorder %v1995_v46, 0.0 }
 0x121   : > { %v1599_v9 = vpop.eup %1598  ;;  %v1256_v40 = vsel %vm1192_vm3, %v1593_v59, %v1224_v16  ;;  %v1130_v45 = vadd.f32 1.0, %v1597_v14  ;;  %v2130_v59 = vadd.f32 %v1766_v23, %v718_v15  ;;  %vm1210_vm8 = vcmp.ge.f32.partialorder %v1999_v10, 0.0 }
 0x122   : > { %v1601_v30 = vpop.eup %1600  ;;  %v1288_v13 = vmul.f32 %v1256_v40, %v944_v63  ;;  %v1272_v51 = vsel %vm1208_vm4, %v1595_v25, %v1240_v3  ;;  %v1146_v39 = vadd.f32 1.0, %v1599_v9  ;;  %v1084_v56 = vmul.f32 1.442695, %v1038_v22 }
 0x123   : > { %v1304_v12 = vmul.f32 %v1272_v51, %v976_v36  ;;  %1612 = vrcp.f32 %v1130_v45  ;;  %v1131_v8 = vadd.f32 1.0, %v1601_v30  ;;  %v1603_v44 = vpop.eup %1602  ;;  %v1054_v47 = vsub.f32 0.0, %v1022_v2 }
 0x124   : > { %1321 = vst.msk [vmem:[%s1934_s30 + $0x40] sm:$0xff] %vm1312_vm2, %v1288_v13  ;;  %1614 = vrcp.f32 %v1146_v39  ;;  %v1147_v29 = vadd.f32 1.0, %v1603_v44  ;;  %v1007_v36 = vand.u32 2147483647, %v2126_v41  ;;  %v1023_v27 = vand.u32 2147483647, %v2130_v59 }
 0x125   : > { %1337 = vst.msk [vmem:[%s1934_s30 + $0xc0] sm:$0xff] %vm1312_vm2, %v1304_v12  ;;  %1616 = vrcp.f32 %v1131_v8  ;;  %v1116_v62 = vmul.f32 1.442695, %v1054_v47  ;;  %v948_v13 = vadd.f32 %v1846_v49, %v1916_v19  ;;  %v980_v51 = vadd.f32 %v1846_v49, %v1923_v43 }
 0x126   : > { %v1605_v11 = vpop.eup %1604  ;;  %1618 = vpow2.f32 %v1082_v35  ;;  %v1039_v18 = vsub.f32 0.0, %v1007_v36  ;;  %v1055_v3 = vsub.f32 0.0, %v1023_v27  ;;  %v950_v8 = vadd.f32 %v1846_v49, %v1948_v33 }
 0x127   : > { %v1607_v63 = vpop.eup %1606  ;;  %v1225_v28 = vsub.f32 1.0, %v1605_v11  ;;  %1620 = vpow2.f32 %v1114_v57  ;;  %vm1195_vm9 = vcmp.ge.f32.partialorder %v2025_v24, 0.0  ;;  %vm1211_vm10 = vcmp.ge.f32.partialorder %v2030_v38, 0.0 }
 0x128   : > { %v1241_v53 = vsub.f32 1.0, %v1607_v63  ;;  %1622 = vrcp.f32 %v1147_v29  ;;  %v1609_v25 = vpop.eup %1608  ;;  %v1086_v31 = vmul.f32 1.442695, %v1039_v18  ;;  %v1118_v40 = vmul.f32 1.442695, %v1055_v3 }
 0x129   : > { %v1257_v60 = vsel %vm1193_vm5, %v1605_v11, %v1225_v28  ;;  %1624 = vpow2.f32 %v1084_v56  ;;  %v1132_v14 = vadd.f32 1.0, %v1609_v25  ;;  %v1611_v9 = vpop.eup %1610  ;;  %v982_v11 = vadd.f32 %v1846_v49, %v1958_v21 }
 0x12a   : > { %v1289_v42 = vmul.f32 %v1257_v60, %v946_v5  ;;  %v1273_v16 = vsel %vm1209_vm6, %v1607_v63, %v1241_v53  ;;  %1626 = vpow2.f32 %v1116_v62  ;;  %v1148_v54 = vadd.f32 1.0, %v1611_v9 }
 0x12b   : > { %v1305_v23 = vmul.f32 %v1273_v16, %v978_v4  ;;  %1628 = vrcp.f32 %v1132_v14  ;;  %v952_v21 = vadd.f32 %v1846_v49, %v1989_v0  ;;  %vm1196_vm11 = vcmp.ge.f32.partialorder %v2057_v37, 0.0 }
 0x12c   : > { %1322 = vst.msk [vmem:[%s1934_s30 + $0x48] sm:$0xff] %vm1312_vm2, %v1289_v42  ;;  %1630 = vpow2.f32 %v1086_v31  ;;  %v984_v18 = vadd.f32 %v1846_v49, %v2001_v50  ;;  %vm1212_vm12 = vcmp.ge.f32.partialorder %v2063_v34, 0.0  ;;  %v954_v31 = vadd.f32 %v1846_v49, %v2035_v61 }
 0x12d   : > { %1338 = vst.msk [vmem:[%s1934_s30 + $0xc8] sm:$0xff] %vm1312_vm2, %v1305_v23  ;;  %1632 = vpow2.f32 %v1118_v40  ;;  %vm1197_vm13 = vcmp.ge.f32.partialorder %v2084_v7, 0.0  ;;  %v986_v34 = vadd.f32 %v1846_v49, %v2040_v1  ;;  %vm1213_vm14 = vcmp.ge.f32.partialorder %v2087_v17, 0.0 }
 0x12e   : > { %1634 = vrcp.f32 %v1148_v54  ;;  %v956_v61 = vadd.f32 %v1846_v49, %v2072_v55  ;;  %vm1198_vm15 = vcmp.ge.f32.partialorder %v2102_v6, 0.0  ;;  %v988_v1 = vadd.f32 %v1846_v49, %v2074_v20 }
 0x12f   : > { %vm1214_vm0 = vcmp.ge.f32.partialorder %v2107_v52, 0.0  ;;  %v958_v20 = vadd.f32 %v1846_v49, %v2104_v26  ;;  %vm1199_vm1 = vcmp.ge.f32.partialorder %v2126_v41, 0.0  ;;  %vm1215_vm3 = vcmp.ge.f32.partialorder %v2130_v59, 0.0 }
 0x130   : > { %v1613_v45 = vpop.eup %1612 }
 0x131   : > { %v1615_v35 = vpop.eup %1614  ;;  %v1226_v58 = vsub.f32 1.0, %v1613_v45 }
 0x132   : > { %v1617_v30 = vpop.eup %1616  ;;  %v1242_v39 = vsub.f32 1.0, %v1615_v35 }
 0x133   : > { %v1619_v57 = vpop.eup %1618  ;;  %v1258_v12 = vsel %vm1194_vm7, %v1613_v45, %v1226_v58  ;;  %v1227_v22 = vsub.f32 1.0, %v1617_v30 }
 0x134   : > { %v1621_v32 = vpop.eup %1620  ;;  %v1290_v2 = vmul.f32 %v1258_v12, %v948_v13  ;;  %v1274_v15 = vsel %vm1210_vm8, %v1615_v35, %v1242_v39  ;;  %v1133_v19 = vadd.f32 1.0, %v1619_v57  ;;  %v990_v12 = vadd.f32 %v1846_v49, %v2109_v48 }
 0x135   : > { %v1623_v43 = vpop.eup %1622  ;;  %v1306_v46 = vmul.f32 %v1274_v15, %v980_v51  ;;  %v1259_v44 = vsel %vm1195_vm9, %v1617_v30, %v1227_v22  ;;  %v1149_v5 = vadd.f32 1.0, %v1621_v32 }
 0x136   : > { %v1625_v4 = vpop.eup %1624  ;;  %1323 = vst.msk [vmem:[%s1934_s30 + $0x50] sm:$0xff] %vm1312_vm2, %v1290_v2  ;;  %v1291_v10 = vmul.f32 %v1259_v44, %v950_v8  ;;  %v1243_v56 = vsub.f32 1.0, %v1623_v43  ;;  %1636 = vrcp.f32 %v1133_v19 }
 0x137   : > { %v1627_v33 = vpop.eup %1626  ;;  %1339 = vst.msk [vmem:[%s1934_s30 + $0xd0] sm:$0xff] %vm1312_vm2, %v1306_v46  ;;  %1638 = vrcp.f32 %v1149_v5  ;;  %v1134_v24 = vadd.f32 1.0, %v1625_v4 }
 0x138   : > { %1324 = vst.msk [vmem:[%s1934_s30 + $0x58] sm:$0xff] %vm1312_vm2, %v1291_v10  ;;  %v1275_v29 = vsel %vm1211_vm10, %v1623_v43, %v1243_v56  ;;  %v1150_v47 = vadd.f32 1.0, %v1627_v33  ;;  %v1629_v28 = vpop.eup %1628 }
 0x139   : > { %v1307_v63 = vmul.f32 %v1275_v29, %v982_v11  ;;  %1640 = vrcp.f32 %v1134_v24  ;;  %v1631_v53 = vpop.eup %1630  ;;  %v1228_v62 = vsub.f32 1.0, %v1629_v28 }
 0x13a   : > { %1642 = vrcp.f32 %v1150_v47  ;;  %v1633_v36 = vpop.eup %1632  ;;  %v1135_v38 = vadd.f32 1.0, %v1631_v53 }
 0x13b   : > { %1340 = vst.msk [vmem:[%s1934_s30 + $0xd8] sm:$0xff] %vm1312_vm2, %v1307_v63  ;;  %v1635_v60 = vpop.eup %1634  ;;  %v1260_v27 = vsel %vm1196_vm11, %v1629_v28, %v1228_v62  ;;  %v1151_v25 = vadd.f32 1.0, %v1633_v36 }
 0x13c   : > { %v1292_v42 = vmul.f32 %v1260_v27, %v952_v21  ;;  %v1244_v16 = vsub.f32 1.0, %v1635_v60  ;;  %1644 = vrcp.f32 %v1135_v38 }
 0x13d   : > { %1646 = vrcp.f32 %v1151_v25 }
 0x13e   : > { %1325 = vst.msk [vmem:[%s1934_s30 + $0x60] sm:$0xff] %vm1312_vm2, %v1292_v42  ;;  %v1276_v23 = vsel %vm1212_vm12, %v1635_v60, %v1244_v16 }
 0x13f   : > { %v1308_v0 = vmul.f32 %v1276_v23, %v984_v18 }
 0x141   : > { %1341 = vst.msk [vmem:[%s1934_s30 + $0xe0] sm:$0xff] %vm1312_vm2, %v1308_v0 }
 0x143   : > { %v1637_v14 = vpop.eup %1636 }
 0x144   : > { %v1639_v37 = vpop.eup %1638  ;;  %v1229_v3 = vsub.f32 1.0, %v1637_v14 }
 0x145   : > { %v1245_v9 = vsub.f32 1.0, %v1639_v37 }
 0x146   : > { %v1641_v50 = vpop.eup %1640  ;;  %v1261_v40 = vsel %vm1197_vm13, %v1637_v14, %v1229_v3 }
 0x147   : > { %v1643_v54 = vpop.eup %1642  ;;  %v1293_v45 = vmul.f32 %v1261_v40, %v954_v31  ;;  %v1277_v35 = vsel %vm1213_vm14, %v1639_v37, %v1245_v9  ;;  %v1230_v58 = vsub.f32 1.0, %v1641_v50 }
 0x148   : > { %v1309_v30 = vmul.f32 %v1277_v35, %v986_v34  ;;  %v1246_v7 = vsub.f32 1.0, %v1643_v54 }
 0x149   : > { %1326 = vst.msk [vmem:[%s1934_s30 + $0x68] sm:$0xff] %vm1312_vm2, %v1293_v45  ;;  %v1262_v13 = vsel %vm1198_vm15, %v1641_v50, %v1230_v58  ;;  %v1645_v39 = vpop.eup %1644 }
 0x14a   : > { %1342 = vst.msk [vmem:[%s1934_s30 + $0xe8] sm:$0xff] %vm1312_vm2, %v1309_v30  ;;  %v1294_v17 = vmul.f32 %v1262_v13, %v956_v61  ;;  %v1278_v51 = vsel %vm1214_vm0, %v1643_v54, %v1246_v7  ;;  %v1647_v55 = vpop.eup %1646  ;;  %v1231_v6 = vsub.f32 1.0, %v1645_v39 }
 0x14b   : > { %v1310_v57 = vmul.f32 %v1278_v51, %v988_v1  ;;  %v1247_v52 = vsub.f32 1.0, %v1647_v55 }
 0x14c   : > { %1327 = vst.msk [vmem:[%s1934_s30 + $0x70] sm:$0xff] %vm1312_vm2, %v1294_v17  ;;  %v1263_v8 = vsel %vm1199_vm1, %v1645_v39, %v1231_v6 }
 0x14d   : > { %1343 = vst.msk [vmem:[%s1934_s30 + $0xf0] sm:$0xff] %vm1312_vm2, %v1310_v57  ;;  %v1295_v22 = vmul.f32 %v1263_v8, %v958_v20  ;;  %v1279_v32 = vsel %vm1215_vm3, %v1647_v55, %v1247_v52 }
 0x14e   : > { %v1311_v2 = vmul.f32 %v1279_v32, %v990_v12 }
 0x14f   : > { %1328 = vst.msk [vmem:[%s1934_s30 + $0x78] sm:$0xff] %vm1312_vm2, %v1295_v22 }
 0x150   : > { %1344 = vst.msk [vmem:[%s1934_s30 + $0xf8] sm:$0xff] %vm1312_vm2, %v1311_v2 }
 0x151 PF: > { %s13_s14 = sadd.s32 1, %s1670_s14   ;;  %s2212_s12 = smov %s1666_s13 }
 0x152   : > { %p10_p5 = scmp.ge.s32.totalorder %s13_s14, 4   ;;  %s2213_s13 = smov %s2215_s15 }
 0x154   :  { %12 = sbr.rel (!%p10_p5) target bundleno = 2 (0x2), region = 73 }

</bundles_post_ra>
